<compile_context>
chip_gen: v7x
topology: tpu7x:2x2x1
jax: 0.10.0
libtpu: 0.0.40
codegen_flags: <defaults>
</compile_context>

<pallas_src>
import jax
import jax.numpy as jnp
from jax.experimental import pallas as pl
from jax.experimental.pallas import tpu as pltpu


def _round_up(x: int, m: int) -> int:
    return ((x + m - 1) // m) * m


# Conservative per-call VMEM budget for the pipelined tiles: fits comfortably
# inside v7x's 64 MiB physical VMEM (with double-buffering) and is well under
# the 128 MiB of v5e/v6e.
_VMEM_TILE_BUDGET = 24 * 1024 * 1024
_MAX_TILE_N = 2048
_MAX_TILE_DOUT = 2048


def _lff_kernel(x_ref, w_ref, b_ref, o_ref):
    # MXU matmul with f32 accumulation; pi is already folded into W and b,
    # so the epilogue is just bias-add + sin (EUP) in f32.
    acc = jnp.dot(x_ref[...], w_ref[...], preferred_element_type=jnp.float32)
    o_ref[...] = jnp.sin(acc + b_ref[...]).astype(o_ref.dtype)


def prepare_lff_params(weight, bias, compute_dtype=jnp.bfloat16):
    """One-time prep: transpose, fold pi, pad out_features to a 128 multiple.

    weight: (out_features, in_features) f32; bias: (out_features,) f32.
    Returns (w_prepped, b_prepped):
      w_prepped: (in_features, d_out_padded) in `compute_dtype`
      b_prepped: (1, d_out_padded) f32 (epilogue runs in f32)
    """
    d_out, d_in = weight.shape
    d_out_p = _round_up(max(d_out, 128), 128)
    if d_out_p > _MAX_TILE_DOUT:
        d_out_p = _round_up(d_out_p, _MAX_TILE_DOUT)
    w_t = (jnp.pi * weight.T).astype(compute_dtype)
    b = (jnp.pi * bias).astype(jnp.float32)
    w_p = jnp.zeros((d_in, d_out_p), compute_dtype).at[:, :d_out].set(w_t)
    b_p = jnp.zeros((1, d_out_p), jnp.float32).at[:, :d_out].set(b)
    return w_p, b_p


def _auto_tile_n(d_in, tile_dout, in_isz, out_isz):
    # Double-buffered W + bias (grid-invariant, but Pallas still allocates 2
    # buffers) plus double-buffered x and out tiles per row.
    fixed = 2 * (d_in * tile_dout * in_isz + tile_dout * 4)
    per_row = 2 * (d_in * in_isz + tile_dout * out_isz)
    tile = _MAX_TILE_N
    while tile > 8 and fixed + tile * per_row > _VMEM_TILE_BUDGET:
        tile //= 2
    return tile


def lff_forward(x, w_prepped, b_prepped, out_features, *, out_dtype=None, tile_n=None):
    """y = sin(pi*(x @ W^T + b)), using params from prepare_lff_params."""
    n, d_in = x.shape
    d_in_w, d_out_p = w_prepped.shape
    assert d_in == d_in_w, (d_in, d_in_w)
    out_dtype = jnp.dtype(out_dtype) if out_dtype is not None else x.dtype
    compute_dtype = w_prepped.dtype
    in_isz = jnp.dtype(compute_dtype).itemsize
    out_isz = jnp.dtype(out_dtype).itemsize

    # Output tiling (lane-dense; d_out_p is always a multiple of tile_dout).
    tile_dout = d_out_p if d_out_p <= _MAX_TILE_DOUT else _MAX_TILE_DOUT

    # Batch tiling: multiple of 8, bounded by the VMEM budget and by N.
    if tile_n is None:
        tile_n = _auto_tile_n(d_in, tile_dout, in_isz, out_isz)
    tile_n = max(8, _round_up(min(int(tile_n), _round_up(n, 8)), 8))

    # Pad ragged N instead of asserting divisibility.
    n_p = _round_up(n, tile_n)
    x_c = x.astype(compute_dtype)
    if n_p != n:
        x_c = jnp.zeros((n_p, d_in), compute_dtype).at[:n].set(x_c)

    grid = (n_p // tile_n, d_out_p // tile_dout)

    vmem_needed = (
        2 * tile_n * d_in * in_isz          # double-buffered x tiles
        + 2 * tile_n * tile_dout * out_isz  # double-buffered out tiles
        + 2 * d_in * tile_dout * in_isz     # weight block (2 buffers)
        + 2 * tile_dout * 4                 # bias block
    )
    # Raise the scoped VMEM limit to cover the buffers + headroom; stay below
    # v7x's 64 MiB physical VMEM.
    vmem_limit = int(min(max(vmem_needed + (8 << 20), 32 << 20), 56 << 20))

    cost = pl.CostEstimate(
        flops=2 * n_p * d_in * d_out_p,
        transcendentals=n_p * d_out_p,
        bytes_accessed=(n_p * d_in * in_isz + d_in * d_out_p * in_isz
                        + d_out_p * 4 + n_p * d_out_p * out_isz),
    )

    out = pl.pallas_call(
        _lff_kernel,
        out_shape=jax.ShapeDtypeStruct((n_p, d_out_p), out_dtype),
        grid_spec=pltpu.PrefetchScalarGridSpec(
            num_scalar_prefetch=0,
            grid=grid,
            in_specs=[
                pl.BlockSpec((tile_n, d_in), lambda i, j: (i, 0)),
                pl.BlockSpec((d_in, tile_dout), lambda i, j: (0, j)),
                pl.BlockSpec((1, tile_dout), lambda i, j: (0, j)),
            ],
            out_specs=pl.BlockSpec((tile_n, tile_dout), lambda i, j: (i, j)),
        ),
        compiler_params=pltpu.CompilerParams(
            dimension_semantics=("parallel", "parallel"),
            vmem_limit_bytes=vmem_limit,
        ),
        cost_estimate=cost,
    )(x_c, w_prepped, b_prepped)

    if n_p != n or d_out_p != out_features:
        out = out[:n, :out_features]
    return out


def init_lff_params(key, in_features, out_features, scale=1.0, init="iso"):
    """Deterministic parameter init matching LFF.__init__."""
    kw, kb = jax.random.split(key)
    if init == "iso":
        weight = scale / in_features * jax.random.normal(
            kw, (out_features, in_features), dtype=jnp.float32
        )
    else:
        weight = jax.random.uniform(
            kw, (out_features, in_features), dtype=jnp.float32,
            minval=-scale / in_features, maxval=scale / in_features,
        )
    bias = jax.random.uniform(
        kb, (out_features,), dtype=jnp.float32, minval=-1.0, maxval=1.0
    )
    return weight, bias


if __name__ == "__main__":
    in_features = 32
    out_features = 64
    batch = 8

    key = jax.random.PRNGKey(0)
    kx, kp = jax.random.split(key)
    x = jax.random.normal(kx, (batch, in_features), dtype=jnp.float32)
    weight, bias = init_lff_params(kp, in_features, out_features, scale=1.0, init="iso")

    # Reference (plain JAX / original module semantics).
    ref = jnp.sin(jnp.pi * (x @ weight.T + bias))

    # f32 compute path: exact module semantics.
    w32, b32 = prepare_lff_params(weight, bias, compute_dtype=jnp.float32)
    out32 = jax.block_until_ready(lff_forward(x, w32, b32, out_features))
    assert out32.shape == (batch, out_features)
    assert jnp.allclose(out32, ref, atol=1e-4, rtol=1e-4)

    # bf16 fast path: halves streamed HBM bytes; f32 accumulation + f32 epilogue.
    wbf, bbf = prepare_lff_params(weight, bias, compute_dtype=jnp.bfloat16)
    outbf = jax.block_until_ready(lff_forward(x, wbf, bbf, out_features))
    assert outbf.shape == (batch, out_features)
    assert jnp.allclose(outbf, ref, atol=3e-2, rtol=0.0)

    print("KERNEL_OK")
</pallas_src>

<mosaic_0001>
module attributes {stable_mosaic.version = 11 : i64} {
  func.func @_lff_kernel(%arg0: i32, %arg1: i32, %arg2: memref<8x32xf32, #tpu.memory_space<vmem>>, %arg3: memref<32x128xf32, #tpu.memory_space<vmem>>, %arg4: memref<1x128xf32, #tpu.memory_space<vmem>>, %arg5: memref<8x128xf32, #tpu.memory_space<vmem>>) attributes {dimension_semantics = [#tpu.dimension_semantics<parallel>, #tpu.dimension_semantics<parallel>], iteration_bounds = array<i64: 1, 1>, scalar_prefetch = 0 : i64, scratch_operands = 0 : i64, tpu.core_type = #tpu.core_type<tc>, window_params = [{transform_indices = @transform_0, window_bounds = array<i64: 8, 32>}, {transform_indices = @transform_1, window_bounds = array<i64: 32, 128>}, {transform_indices = @transform_2, window_bounds = array<i64: 1, 128>}, {transform_indices = @transform_3, window_bounds = array<i64: 8, 128>}]} {
    %c0 = arith.constant 0 : index
    %c0_0 = arith.constant 0 : index
    %0 = vector.load %arg2[%c0, %c0_0] : memref<8x32xf32, #tpu.memory_space<vmem>>, vector<8x32xf32>
    %c0_1 = arith.constant 0 : index
    %c0_2 = arith.constant 0 : index
    %1 = vector.load %arg3[%c0_1, %c0_2] : memref<32x128xf32, #tpu.memory_space<vmem>>, vector<32x128xf32>
    %cst = arith.constant dense<0.000000e+00> : vector<8x128xf32>
    %2 = tpu.matmul %0, %1, %cst {dimension_numbers = #tpu.dot_dimension_numbers<[1], [0], [0], [1], [0, 0, 1, 1], [], []>} : vector<8x32xf32>, vector<32x128xf32>, vector<8x128xf32> -> vector<8x128xf32>
    %c0_3 = arith.constant 0 : index
    %c0_4 = arith.constant 0 : index
    %3 = vector.load %arg4[%c0_3, %c0_4] : memref<1x128xf32, #tpu.memory_space<vmem>>, vector<1x128xf32>
    %4 = vector.broadcast %3 : vector<1x128xf32> to vector<8x128xf32>
    %5 = arith.addf %2, %4 : vector<8x128xf32>
    %6 = math.sin %5 : vector<8x128xf32>
    %c0_5 = arith.constant 0 : index
    %c0_6 = arith.constant 0 : index
    %7 = vector.load %arg5[%c0_5, %c0_6] : memref<8x128xf32, #tpu.memory_space<vmem>>, vector<8x128xf32>
    tpu.vector_store %arg5[%c0_5, %c0_6], %6 {strides = array<i32>} : memref<8x128xf32, #tpu.memory_space<vmem>>, vector<8x128xf32>,
    return
  }
  func.func @transform_0(%arg0: i32, %arg1: i32) -> (i32, i32) {
    %c0_i32 = arith.constant 0 : i32
    %c0_i32_0 = arith.constant 0 : i32
    return %arg0, %c0_i32 : i32, i32
  }
  func.func @transform_1(%arg0: i32, %arg1: i32) -> (i32, i32) {
    %c0_i32 = arith.constant 0 : i32
    %c0_i32_0 = arith.constant 0 : i32
    return %c0_i32, %arg1 : i32, i32
  }
  func.func @transform_2(%arg0: i32, %arg1: i32) -> (i32, i32) {
    %c0_i32 = arith.constant 0 : i32
    %c0_i32_0 = arith.constant 0 : i32
    return %c0_i32, %arg1 : i32, i32
  }
  func.func @transform_3(%arg0: i32, %arg1: i32) -> (i32, i32) {
    %c0_i32 = arith.constant 0 : i32
    return %arg0, %arg1 : i32, i32
  }
}

</mosaic_0001>

<bundles_post_ra>
// kernel: tpu_custom_call.1
= control target key start
LH: loop header
LB: loop body
LE: loop exit
PB: predicated region body
PF: predicated region fallthrough
CT: control target
= control target key end

     0   :  { %8 = vsyncpa [#allocation3], 0  ;;  %s471_s0 = inlined_call_operand.hbm [shape: f32[8,32], index: 0, kind: input, shape index: {}]   ;;  %s472_s1 = inlined_call_operand.hbm [shape: f32[32,128], index: 1, kind: input, shape index: {}]   ;;  %s473_s2 = inlined_call_operand.vmem [shape: f32[1,128], index: 2, kind: input, shape index: {}]   ;;  %s474_s3 = inlined_call_operand.hbm [shape: f32[8,128], index: 3, kind: output, shape index: {}]  }
   0x1   :  { %9 = vsyncpa [#allocation6], 0 }
   0x2   :  { %10 = vsyncpa [#allocation4], 0  ;;  %s370_s12 = smov [#allocation2]   ;;  %s371_s14 = smov [#allocation5]  }
   0x3   :  { %s17_s13 = sshll.u32 %s370_s12, 4  ;;  %s26_s15 = sshll.u32 %s371_s14, 4  ;;  %s18_s13 = int_to_ptr.vmem [resolvable:$true] %s17_s13  ;;  %s404_s15 = int_to_ptr.vmem [resolvable:$true] %s26_s15 }
   0x4   :  { %s298_s18 = scalar_lea.hbm %s471_s0, 128 }
   0x5   :  { %p299_p0 = scmp.ne.s32.totalorder %s471_s0, %s298_s18  ;;  %p302_p1 = scmp.lt.u32.totalorder %s298_s18, %s471_s0 }
   0x7   :  { %p304_p2 = pnand %p302_p1, %p299_p0 }
   0x9   :  { %307 = shalt.err (!%p304_p2)
}
   0xa   :  { %s308_s23 = scalar_lea.vmem %s18_s13, 128  ;;  %p313_p4 = scmp.lt.s32.totalorder %s18_s13, %s18_s13 }
   0xb   :  { %p309_p3 = scmp.ne.s32.totalorder %s18_s13, %s308_s23  ;;  %p314_p5 = scmp.lt.s32.totalorder %s308_s23, %s308_s23 }
   0xd   :  { %p315_p6 = por %p314_p5, %p313_p4 }
   0xf   :  { %p316_p7 = pnand %p315_p6, %p309_p3 }
  0x11   :  { %319 = shalt.err (!%p316_p7)
}
  0x12   :  { %20 = dma.hbm_to_vmem [thread:$0]  %s471_s0, 128, %s18_s13, [#allocation3]  }
  0x13   :  { %s320_s28 = scalar_lea.hbm %s472_s1, 512 }
  0x14   :  { %p321_p8 = scmp.ne.s32.totalorder %s472_s1, %s320_s28  ;;  %p324_p9 = scmp.lt.u32.totalorder %s320_s28, %s472_s1 }
  0x16   :  { %p326_p10 = pnand %p324_p9, %p321_p8 }
  0x18   :  { %329 = shalt.err (!%p326_p10)
}
  0x19   :  { %s330_s6 = scalar_lea.vmem %s404_s15, 512  ;;  %p335_p12 = scmp.lt.s32.totalorder %s404_s15, %s404_s15 }
  0x1a   :  { %p331_p11 = scmp.ne.s32.totalorder %s404_s15, %s330_s6  ;;  %p336_p13 = scmp.lt.s32.totalorder %s330_s6, %s330_s6 }
  0x1c   :  { %p337_p0 = por %p336_p13, %p335_p12 }
  0x1e   :  { %p338_p1 = pnand %p337_p0, %p331_p11 }
  0x20   :  { %341 = shalt.err (!%p338_p1)
}
  0x21   :  { %s372_s0 = smov 128   ;;  %s373_s7 = smov 8  }
  0x22   :  { %32 = dma.hbm_to_vmem [thread:$0]  %s472_s1, 512, %s404_s15, [#allocation6], %s372_s0, %s372_s0, %s373_s7  }
  0x23   :  { %364 = dma.done.wait [#allocation3], 128  }
  0x24   :  { %365 = vsyncadd [#allocation3], 4294967168 }
  0x25   :  { %366 = dma.done.wait [#allocation6], 512  }
  0x26   :  { %367 = vsyncadd [#allocation6], 4294966784  ;;  %v374_v0 = vmov 0.0|0.0   ;;  %vm375_vm0 = vmmov 0   ;;  %v376_v1 = vmov 0.0   ;;  %v42_v2 = vld [vmem:[#allocation5] sm:$0xff] }
  0x27   :  { %270 = vmatprep.subr.bf16.mxu0 %v374_v0  ;;  %267 = vmatprep.mubr.msk.f32.mxu0 %vm375_vm0, %v376_v1  ;;  %v43_v3 = vld [vmem:[#allocation5 + $0x8] sm:$0xff]  ;;  %v44_v4 = vld [vmem:[#allocation5 + $0x10] sm:$0xff]  ;;  %v45_v6 = vld [vmem:[#allocation5 + $0x18] sm:$0xff]  ;;  %vm53_vm1 = vcmask 261120   ;;  %v377_v23 = vmov 683565275  }
  0x28   :  { %v271_v5 = vpack.c.bf16 %v43_v3, %v42_v2  ;;  %v274_v7 = vpack.c.bf16 %v45_v6, %v44_v4  ;;  %v41_v8 = vld [vmem:[#allocation2] sm:$0xff]  ;;  %v378_v25 = vmov 2475754826   ;;  %v379_v28 = vmov 2131351028  }
  0x29   :  { %v248_v9 = vld [vmem:[%s473_s2] ss:$0 sm:$0xff]  ;;  %v380_v31 = vmov 2102212464   ;;  %v381_v34 = vmov 920167782  }
  0x2a   :  { %272 = vmatpush3.bf16.msra.mxu0 %v271_v5  ;;  %v382_v37 = vmov 1326507024   ;;  %s383_s2 = smov [#allocation7]  }
  0x2b   :  { %273 = vmatprep.subr.bf16.mxu0 %v374_v0  ;;  %s238_s11 = sshll.u32 %s383_s2, 4  ;;  %s239_s11 = int_to_ptr.vmem [resolvable:$true] %s238_s11 }
  0x2c   :  { %s342_s12 = scalar_lea.vmem %s239_s11, 128  ;;  %p347_p3 = scmp.lt.s32.totalorder %s239_s11, %s239_s11 }
  0x2d   :  { %p343_p2 = scmp.ne.s32.totalorder %s239_s11, %s342_s12  ;;  %p348_p4 = scmp.lt.s32.totalorder %s342_s12, %s342_s12 }
  0x2e   :  { %275 = vmatpush3.bf16.msra.mxu0 %v274_v7 }
  0x2f   :  { %p349_p5 = por %p348_p4, %p347_p3 }
  0x31   :  { %268 = vmatmul.mubr.msk.f32.vlgmr.msra.gmra.mrb[0].mxu0 %vm53_vm1, %v41_v8  ;;  %p350_p6 = pnand %p349_p5, %p343_p2 }
 0x104   :  { %v123_v10 = vpop.f32.mrb[0].mxu0 }
 0x105   :  { %v438_v11 = vadd.f32 %v248_v9, %v123_v10  ;;  %v269_v12 = vpop.f32.mrb[1].mxu0 }
 0x107   :  { %v130_v13 = vand.u32 2139095040, %v438_v11  ;;  %v127_v17 = vand.u32 2147483647, %v438_v11  ;;  %vm129_vm9 = vcmp.lt.s32.totalorder %v438_v11, 0  ;;  %vm219_vm14 = vweird.f32 %v438_v11 }
 0x109   :  { %v131_v14 = vshrl.u32 %v130_v13, 23  ;;  %v134_v20 = vand.u32 8388607, %v127_v17  ;;  %vm128_vm10 = vcmp.le.f32.partialorder %v127_v17, 0.7853982 }
 0x10b   :  { %v250_v15 = vadd.s32 4294967169, %v131_v14  ;;  %v135_v39 = vor.u32 8388608, %v134_v20 }
 0x10d   :  { %v137_v16 = vadd.s32 1, %v250_v15  ;;  %v175_v53 = vshll.u32 %v135_v39, 8 }
 0x10f   :  { %vm138_vm2 = vcmp.gt.s32.totalorder %v137_v16, 0 }
 0x110   :  { %v139_v18 = vsel %vm138_vm2, %v137_v16, 0 }
 0x111   :  { %v141_v19 = vand.u32 31, %v139_v18  ;;  %v140_v22 = vshrl.u32 %v139_v18, 5 }
 0x113   :  { %v142_v21 = vsub.s32 32, %v141_v19  ;;  %v144_v24 = vshll.u32 %v377_v23, %v141_v19  ;;  %v147_v26 = vshll.u32 %v378_v25, %v141_v19  ;;  %v150_v30 = vshll.u32 %v379_v28, %v141_v19 }
 0x114   :  { %v153_v33 = vshll.u32 %v380_v31, %v141_v19  ;;  %v156_v36 = vshll.u32 %v381_v34, %v141_v19  ;;  %vm159_vm3 = vcmp.lt.s32.totalorder %v140_v22, 1  ;;  %vm162_vm4 = vcmp.lt.s32.totalorder %v140_v22, 4 }
 0x115   :  { %v145_v27 = vshrl.u32 %v378_v25, %v142_v21  ;;  %v148_v29 = vshrl.u32 %v379_v28, %v142_v21  ;;  %v151_v32 = vshrl.u32 %v380_v31, %v142_v21  ;;  %v154_v35 = vshrl.u32 %v381_v34, %v142_v21 }
 0x116   :  { %v157_v38 = vshrl.u32 %v382_v37, %v142_v21  ;;  %v143_v48 = vshrl.u32 %v377_v23, %v142_v21  ;;  %vm161_vm5 = vcmp.lt.s32.totalorder %v140_v22, 3  ;;  %vm160_vm6 = vcmp.lt.s32.totalorder %v140_v22, 2 }
 0x117   :  { %v146_v40 = vor.u32 %v145_v27, %v144_v24  ;;  %v149_v41 = vor.u32 %v148_v29, %v147_v26  ;;  %v152_v42 = vor.u32 %v151_v32, %v150_v30  ;;  %v155_v43 = vor.u32 %v154_v35, %v153_v33 }
 0x118   :  { %v158_v44 = vor.u32 %v157_v38, %v156_v36 }
 0x119   :  { %v164_v45 = vsel %vm162_vm4, %v152_v42, 2102212464  ;;  %v167_v46 = vsel %vm159_vm3, %v146_v40, %v149_v41  ;;  %v171_v47 = vsel %vm159_vm3, %v149_v41, %v152_v42  ;;  %v168_v49 = vsel %vm162_vm4, %v155_v43, 920167782 }
 0x11a   :  { %v172_v50 = vsel %vm162_vm4, %v158_v44, 1326507024  ;;  %v169_v51 = vsel %vm161_vm5, %v152_v42, %v168_v49  ;;  %v163_v54 = vsel %vm159_vm3, %v143_v48, %v146_v40  ;;  %v165_v55 = vsel %vm161_vm5, %v149_v41, %v164_v45 }
 0x11b   :  { %v173_v52 = vsel %vm161_vm5, %v155_v43, %v172_v50  ;;  %v170_v56 = vsel %vm160_vm6, %v167_v46, %v169_v51  ;;  %v166_v62 = vsel %vm160_vm6, %v163_v54, %v165_v55 }
 0x11c   :  { %v174_v57 = vsel %vm160_vm6, %v171_v47, %v173_v52  ;;  %v447_v60 = vmul.u32.u64.low %v175_v53, %v170_v56  ;;  %v448_v61 = vmul.u32.u64.high %v175_v53, %v170_v56, %v447_v60  ;;  %v182_v0 = vmul.u32 %v175_v53, %v166_v62 }
 0x11d   :  { %v444_v58 = vmul.u32.u64.low %v175_v53, %v174_v57  ;;  %v445_v59 = vmul.u32.u64.high %v175_v53, %v174_v57, %v444_v58 }
 0x11e   :  { %v185_v63 = vadd.s32 1, %v448_v61 }
 0x11f   :  { %vm184_vm7 = vc.u32 %v445_v59, %v447_v60  ;;  %v183_v13 = vadd.s32 %v447_v60, %v445_v59 }
 0x120   :  { %v186_v1 = vsel %vm184_vm7, %v185_v63, %v448_v61 }
 0x121   :  { %v187_v2 = vadd.s32 %v186_v1, %v182_v0 }
 0x123   :  { %v188_v3 = vadd.s32 536870912, %v187_v2 }
 0x125   :  { %v189_v4 = vshrl.u32 %v188_v3, 30 }
 0x127   :  { %v190_v5 = vshll.u32 %v189_v4, 30  ;;  %v213_v26 = vsub.s32 4, %v189_v4 }
 0x129   :  { %v191_v6 = vsub.s32 %v187_v2, %v190_v5  ;;  %v214_v29 = vsel %vm129_vm9, %v213_v26, %v189_v4 }
 0x12a   :  { %v216_v31 = vsel %vm128_vm10, 0, %v214_v29 }
 0x12b   :  { %v193_v7 = vsub.s32 0, %v191_v6  ;;  %v220_v32 = vadd.s32 3, %v216_v31 }
 0x12d   :  { %v251_v8 = vmin.u32 %v193_v7, %v191_v6  ;;  %v221_v33 = vand.u32 3, %v220_v32 }
 0x12f   :  { %v195_v9 = vclz %v251_v8  ;;  %vm226_vm11 = vcmp.eq.s32.totalorder %v221_v33, 2  ;;  %vm223_vm12 = vcmp.eq.s32.totalorder %v221_v33, 0  ;;  %vm222_vm13 = vcmp.lt.s32.totalorder %v221_v33, 2 }
 0x131   :  { %v252_v10 = vadd.s32 4294967294, %v195_v9 }
 0x133   :  { %vm253_vm8 = vcmp.lt.s32.totalorder %v252_v10, 0 }
 0x134   :  { %v198_v12 = vsel %vm253_vm8, 0, %v252_v10 }
 0x135   :  { %v199_v14 = vsub.s32 32, %v198_v12  ;;  %v203_v15 = vsub.s32 4294967266, %v198_v12  ;;  %v200_v16 = vshll.u32 %v191_v6, %v198_v12 }
 0x137   :  { %v201_v18 = vshrl.u32 %v183_v13, %v199_v14  ;;  %v204_v19 = vadd.s32 127, %v203_v15 }
 0x139   :  { %v202_v20 = vor.u32 %v201_v18, %v200_v16  ;;  %v205_v21 = vshll.u32 %v204_v19, 23 }
 0x13b   :  { %v206_v22 = vor.u32 4788187, %v205_v21  ;;  %v209_v24 = vcvt.s32.f32 %v202_v20 }
 0x13d   :  { %v207_v23 = vand.u32 2147483647, %v206_v22 }
 0x13f   :  { %v210_v25 = vmul.f32 %v209_v24, %v207_v23 }
 0x141   :  { %v211_v27 = vxor.u32 2147483648, %v210_v25 }
 0x143   :  { %v212_v28 = vsel %vm129_vm9, %v211_v27, %v210_v25 }
 0x144   :  { %v215_v30 = vsel %vm128_vm10, %v438_v11, %v212_v28 }
 0x145   :  { %294 = vcosq.f32 %v215_v30 }
 0x146   :  { %296 = vsinq.f32 %v215_v30 }
 0x14f   :  { %v295_v34 = vpop.eup %294 }
 0x150   :  { %v297_v35 = vpop.eup %296  ;;  %v227_v36 = vxor.u32 2147483648, %v295_v34 }
 0x151   :  { %v224_v37 = vxor.u32 2147483648, %v297_v35 }
 0x152   :  { %v228_v38 = vsel %vm226_vm11, %v227_v36, %v297_v35 }
 0x153   :  { %v225_v39 = vsel %vm223_vm12, %v295_v34, %v224_v37 }
 0x154   :  { %v229_v17 = vsel %vm222_vm13, %v225_v39, %v228_v38 }
 0x155   :  { %v230_v40 = vsel %vm219_vm14, nan, %v229_v17 }
 0x156   :  { %231 = vst [vmem:[#allocation7] sm:$0xff] %v230_v40 }
 0x157   :  { %353 = shalt.err (!%p350_p6)
}
 0x158   :  { %s354_s15 = scalar_lea.hbm %s474_s3, 128 }
 0x159   :  { %p355_p7 = scmp.ne.s32.totalorder %s474_s3, %s354_s15  ;;  %p358_p8 = scmp.lt.u32.totalorder %s354_s15, %s474_s3 }
 0x15b   :  { %p360_p9 = pnand %p358_p8, %p355_p7 }
 0x15d   :  { %363 = shalt.err (!%p360_p9)
}
 0x15e   :  { %241 = dma.vmem_to_hbm [thread:$0]  %s239_s11, 128, %s474_s3, [#allocation4]  }
 0x15f   :  { %368 = dma.done.wait [#allocation4], 128  }
 0x160   :  { %369 = vsyncadd [#allocation4], 4294967168 }
 0x161   :  { %245 = vsyncpa [#allocation3], 1 }
 0x162   :  { %246 = vsyncpa [#allocation6], 1 }
 0x163   :  { %247 = vsyncpa [#allocation4], 1 }

</bundles_post_ra>
